<compile_context>
chip_gen: v7x
topology: tpu7x:2x2x1
jax: 0.10.0
libtpu: 0.0.40
codegen_flags: <defaults>
</compile_context>

<pallas_src>
import functools
import math

import jax
import jax.numpy as jnp
from jax.experimental import pallas as pl
from jax.experimental.pallas import tpu as pltpu

NEG_INF = -1e20  # ParlAI's neginf() for float32


def _mha_kernel(x_ref, mask_ref, wqkv_ref, bqkv_ref, wo_ref, bo_ref,
                out_ref, attn_ref, *, n_heads, dim_per_head):
    # x_ref block: (Bb, S, D); mask: (Bb, S); wqkv: (D, 3D); bqkv: (1, 3D)
    # wo: (D, D) pre-transposed; bo: (1, D); attn_ref: (Bb, S, D) VMEM scratch.
    Bb, S, D = x_ref.shape
    H, dph = n_heads, dim_per_head
    cdt = x_ref.dtype  # MXU input dtype (bf16 when inputs are bf16, else f32)

    x2 = x_ref[...].reshape(Bb * S, D)  # collapse leading dims (lane dim unchanged)

    # Fused Q/K/V projection: one big MXU matmul, f32 accumulation.
    # The 1/sqrt(dph) scale is already folded into the Q columns host-side.
    qkv = jnp.dot(x2, wqkv_ref[...], preferred_element_type=jnp.float32) + bqkv_ref[...]

    # Additive mask bias, computed + broadcast once (hoisted out of the head loop;
    # JAX does not CSE broadcast_in_dim, so materialize it exactly once).
    bias = jnp.where(mask_ref[...] == 0.0, jnp.float32(NEG_INF), jnp.float32(0.0))  # (Bb, S)
    bias = jnp.broadcast_to(bias[:, None, :], (Bb, S, S))  # broadcast over query axis

    for h in range(H):  # small static loop over heads
        q_lo = 0 * D + h * dph
        k_lo = 1 * D + h * dph
        v_lo = 2 * D + h * dph
        # Per-head static lane slices of the fused qkv result (no full q/k/v copies).
        qh = qkv[:, q_lo:q_lo + dph].reshape(Bb, S, dph).astype(cdt)
        kh = qkv[:, k_lo:k_lo + dph].reshape(Bb, S, dph).astype(cdt)
        vh = qkv[:, v_lo:v_lo + dph].reshape(Bb, S, dph).astype(cdt)

        # scores: contract last dims of q and k (no transpose), batched over Bb.
        scores = jnp.einsum('bqd,bkd->bqk', qh, kh,
                            preferred_element_type=jnp.float32) + bias  # (Bb, S, S) f32

        # numerically-stable softmax along the key axis (all f32)
        m = jnp.max(scores, axis=-1, keepdims=True)
        e = jnp.exp(scores - m)
        p = e * pl.reciprocal(jnp.sum(e, axis=-1, keepdims=True), approx=True)

        att_h = jnp.einsum('bqk,bkd->bqd', p.astype(cdt), vh,
                           preferred_element_type=jnp.float32)  # (Bb, S, dph) f32
        attn_ref[:, :, q_lo:q_lo + dph] = att_h.astype(attn_ref.dtype)

    # Single output projection over all heads at once.
    att2 = attn_ref[...].reshape(Bb * S, D)
    out = jnp.dot(att2, wo_ref[...], preferred_element_type=jnp.float32) + bo_ref[...]
    # NOTE: for production D (multiple of 128) this store is lane-dense; at the
    # toy D=32 used below it falls back to masked stores.
    out_ref[...] = out.reshape(Bb, S, D).astype(out_ref.dtype)


def _choose_block_b(B, S, D, itemsize, budget_bytes=2 << 20):
    """Largest divisor of B whose (Bb, S, D) block stays under ~2 MB."""
    per_row = max(1, S * D * itemsize)
    best = 1
    for cand in range(1, B + 1):
        if B % cand == 0 and cand * per_row <= budget_bytes:
            best = cand
    return best


def multi_head_attention(query, mask, params, n_heads, *, block_b=None):
    """query: (B, S, D) f32 or bf16; mask: (B, S), nonzero = keep, 0 = masked."""
    B, S, D = query.shape
    assert D % n_heads == 0
    dph = D // n_heads
    inv_scale = 1.0 / math.sqrt(dph)

    wq, bq, wk, bk, wv, bv, wo, bo = params
    compute_dtype = jnp.bfloat16 if query.dtype == jnp.bfloat16 else jnp.float32
    f32 = jnp.float32

    # One-time host-side param prep: pre-transpose to (in, out), fuse QKV, and
    # fold the 1/sqrt(dph) scale into the Q columns.
    wqkv_t = jnp.concatenate(
        [(wq.astype(f32) * inv_scale).T, wk.astype(f32).T, wv.astype(f32).T],
        axis=1).astype(compute_dtype)                                  # (D, 3D)
    bqkv = jnp.concatenate(
        [bq.astype(f32) * inv_scale, bk.astype(f32), bv.astype(f32)]
    ).reshape(1, 3 * D).astype(f32)                                    # added to f32 acc
    wo_t = wo.astype(f32).T.astype(compute_dtype)                      # (D, D)
    bo2 = bo.reshape(1, D).astype(f32)

    # Strict {0, 1} mask so the in-kernel `== 0.0` compare is exact.
    mask_f = (mask != 0).astype(f32)

    itemsize = jnp.dtype(query.dtype).itemsize
    if block_b is None:
        block_b = _choose_block_b(B, S, D, itemsize)
    assert B % block_b == 0

    # Rough scoped-VMEM sizing (double-buffered blocks + weights + temporaries).
    blk_bytes = block_b * S * D * itemsize
    w_bytes = 4 * D * D * jnp.dtype(compute_dtype).itemsize + 4 * D * 4
    tmp_bytes = block_b * S * (4 * D + 2 * S) * 4
    vmem_limit = int(min(48 << 20, max(32 << 20, 2 * (4 * blk_bytes + w_bytes + 4 * tmp_bytes))))

    kernel = functools.partial(_mha_kernel, n_heads=n_heads, dim_per_head=dph)

    return pl.pallas_call(
        kernel,
        out_shape=jax.ShapeDtypeStruct((B, S, D), query.dtype),
        grid_spec=pltpu.PrefetchScalarGridSpec(
            num_scalar_prefetch=0,
            grid=(B // block_b,),
            in_specs=[
                pl.BlockSpec((block_b, S, D), lambda b: (b, 0, 0)),  # query block
                pl.BlockSpec((block_b, S), lambda b: (b, 0)),        # mask block
                pl.BlockSpec((D, 3 * D), lambda b: (0, 0)),          # fused Wqkv (in, out)
                pl.BlockSpec((1, 3 * D), lambda b: (0, 0)),          # fused bias
                pl.BlockSpec((D, D), lambda b: (0, 0)),              # Wo (in, out)
                pl.BlockSpec((1, D), lambda b: (0, 0)),              # bo
            ],
            out_specs=pl.BlockSpec((block_b, S, D), lambda b: (b, 0, 0)),
            scratch_shapes=[pltpu.VMEM((block_b, S, D), compute_dtype)],
        ),
        compiler_params=pltpu.CompilerParams(
            dimension_semantics=("parallel",),
            vmem_limit_bytes=vmem_limit,
        ),
    )(query, mask_f, wqkv_t, bqkv, wo_t, bo2)


def _reference(query, mask, params, n_heads):
    """Pure-JAX (f32) reference mirroring the PyTorch forward."""
    wq, bq, wk, bk, wv, bv, wo, bo = params
    B, S, D = query.shape
    dph = D // n_heads
    scale = math.sqrt(dph)

    def prep(t):  # (B, S, D) -> (B*H, S, dph)
        return t.reshape(B, S, n_heads, dph).transpose(0, 2, 1, 3).reshape(B * n_heads, S, dph)

    q = prep(query @ wq.T + bq) / scale
    k = prep(query @ wk.T + bk)
    v = prep(query @ wv.T + bv)
    dot = jnp.einsum("bqd,bkd->bqk", q, k)
    attn_mask = jnp.broadcast_to((mask == 0)[:, None, None, :],
                                 (B, n_heads, S, S)).reshape(B * n_heads, S, S)
    dot = jnp.where(attn_mask, NEG_INF, dot)
    w = jax.nn.softmax(dot, axis=-1)
    att = jnp.einsum("bqk,bkd->bqd", w, v)
    att = att.reshape(B, n_heads, S, dph).transpose(0, 2, 1, 3).reshape(B, S, D)
    return att @ wo.T + bo


if __name__ == "__main__":
    B, S, D, H = 2, 8, 32, 4
    key = jax.random.PRNGKey(0)
    ks = jax.random.split(key, 10)

    # xavier_normal_ for weights: std = sqrt(2 / (fan_in + fan_out)) = sqrt(1/D)
    std = math.sqrt(2.0 / (D + D))
    bound = 1.0 / math.sqrt(D)  # nn.Linear default bias init range
    wq = jax.random.normal(ks[0], (D, D), jnp.float32) * std
    wk = jax.random.normal(ks[1], (D, D), jnp.float32) * std
    wv = jax.random.normal(ks[2], (D, D), jnp.float32) * std
    wo = jax.random.normal(ks[3], (D, D), jnp.float32) * std
    bq = jax.random.uniform(ks[4], (D,), jnp.float32, -bound, bound)
    bk = jax.random.uniform(ks[5], (D,), jnp.float32, -bound, bound)
    bv = jax.random.uniform(ks[6], (D,), jnp.float32, -bound, bound)
    bo = jax.random.uniform(ks[7], (D,), jnp.float32, -bound, bound)
    params = (wq, bq, wk, bk, wv, bv, wo, bo)

    x = jax.random.normal(ks[8], (B, S, D), jnp.float32)
    mask = (jax.random.uniform(ks[9], (B, S)) > 0.3).astype(jnp.float32)
    mask = mask.at[:, 0].set(1.0)  # at least one valid key per row

    ref = _reference(x, mask, params, H)

    # f32 path (tolerance accounts for the approx EUP reciprocal in the softmax)
    out = multi_head_attention(x, mask, params, H)
    jax.block_until_ready(out)
    assert out.shape == (B, S, D)
    assert jnp.allclose(out, ref, atol=2e-2, rtol=2e-2), "f32 mismatch vs JAX reference"

    # bf16 path: all MXU matmuls in bf16, softmax/accumulation kept in f32
    out_bf16 = multi_head_attention(x.astype(jnp.bfloat16), mask, params, H)
    jax.block_until_ready(out_bf16)
    assert out_bf16.dtype == jnp.bfloat16
    assert jnp.allclose(out_bf16.astype(jnp.float32), ref, atol=1e-1, rtol=5e-2), \
        "bf16 mismatch vs JAX reference"

    print("KERNEL_OK")
</pallas_src>

<mosaic_0001>
module attributes {stable_mosaic.version = 11 : i64} {
  func.func @_mha_kernel(%arg0: i32, %arg1: memref<2x8x32xf32, #tpu.memory_space<vmem>>, %arg2: memref<2x8xf32, #tpu.memory_space<vmem>>, %arg3: memref<32x96xf32, #tpu.memory_space<vmem>>, %arg4: memref<1x96xf32, #tpu.memory_space<vmem>>, %arg5: memref<32x32xf32, #tpu.memory_space<vmem>>, %arg6: memref<1x32xf32, #tpu.memory_space<vmem>>, %arg7: memref<2x8x32xf32, #tpu.memory_space<vmem>>, %arg8: memref<2x8x32xf32, #tpu.memory_space<vmem>>) attributes {dimension_semantics = [#tpu.dimension_semantics<parallel>], iteration_bounds = array<i64: 1>, scalar_prefetch = 0 : i64, scratch_operands = 1 : i64, tpu.core_type = #tpu.core_type<tc>, window_params = [{transform_indices = @transform_0, window_bounds = array<i64: 2, 8, 32>}, {transform_indices = @transform_1, window_bounds = array<i64: 2, 8>}, {pipeline_mode = #tpu.pipeline_mode<synchronous>, transform_indices = @transform_2, window_bounds = array<i64: 32, 96>}, {pipeline_mode = #tpu.pipeline_mode<synchronous>, transform_indices = @transform_3, window_bounds = array<i64: 1, 96>}, {pipeline_mode = #tpu.pipeline_mode<synchronous>, transform_indices = @transform_4, window_bounds = array<i64: 32, 32>}, {pipeline_mode = #tpu.pipeline_mode<synchronous>, transform_indices = @transform_5, window_bounds = array<i64: 1, 32>}, {transform_indices = @transform_6, window_bounds = array<i64: 2, 8, 32>}]} {
    %c0 = arith.constant 0 : index
    %c0_0 = arith.constant 0 : index
    %c0_1 = arith.constant 0 : index
    %0 = vector.load %arg1[%c0, %c0_0, %c0_1] : memref<2x8x32xf32, #tpu.memory_space<vmem>>, vector<2x8x32xf32>
    %1 = vector.shape_cast %0 : vector<2x8x32xf32> to vector<16x32xf32>
    %c0_2 = arith.constant 0 : index
    %c0_3 = arith.constant 0 : index
    %2 = vector.load %arg3[%c0_2, %c0_3] : memref<32x96xf32, #tpu.memory_space<vmem>>, vector<32x96xf32>
    %cst = arith.constant dense<0.000000e+00> : vector<16x96xf32>
    %3 = tpu.matmul %1, %2, %cst {dimension_numbers = #tpu.dot_dimension_numbers<[1], [0], [0], [1], [0, 0, 1, 1], [], []>} : vector<16x32xf32>, vector<32x96xf32>, vector<16x96xf32> -> vector<16x96xf32>
    %c0_4 = arith.constant 0 : index
    %c0_5 = arith.constant 0 : index
    %4 = vector.load %arg4[%c0_4, %c0_5] : memref<1x96xf32, #tpu.memory_space<vmem>>, vector<1x96xf32>
    %5 = vector.broadcast %4 : vector<1x96xf32> to vector<16x96xf32>
    %6 = arith.addf %3, %5 : vector<16x96xf32>
    %c0_6 = arith.constant 0 : index
    %c0_7 = arith.constant 0 : index
    %7 = vector.load %arg2[%c0_6, %c0_7] : memref<2x8xf32, #tpu.memory_space<vmem>>, vector<2x8xf32>
    %cst_8 = arith.constant 0.000000e+00 : f32
    %8 = vector.broadcast %cst_8 : f32 to vector<2x8xf32>
    %9 = arith.cmpf oeq, %7, %8 : vector<2x8xf32>
    %cst_9 = arith.constant -1.000000e+20 : f32
    %cst_10 = arith.constant 0.000000e+00 : f32
    %10 = vector.broadcast %cst_9 : f32 to vector<2x8xf32>
    %11 = vector.broadcast %cst_10 : f32 to vector<2x8xf32>
    %12 = arith.select %9, %10, %11 : vector<2x8xi1>, vector<2x8xf32>
    %13 = vector.shape_cast %12 : vector<2x8xf32> to vector<2x1x8xf32>
    %14 = vector.shape_cast %13 : vector<2x1x8xf32> to vector<2x1x8xf32>
    %15 = vector.broadcast %14 : vector<2x1x8xf32> to vector<2x8x8xf32>
    %16 = vector.extract_strided_slice %6 {offsets = [0, 0], sizes = [16, 8], strides = [1, 1]} : vector<16x96xf32> to vector<16x8xf32>
    %17 = vector.shape_cast %16 : vector<16x8xf32> to vector<2x8x8xf32>
    %18 = vector.extract_strided_slice %6 {offsets = [0, 32], sizes = [16, 8], strides = [1, 1]} : vector<16x96xf32> to vector<16x8xf32>
    %19 = vector.shape_cast %18 : vector<16x8xf32> to vector<2x8x8xf32>
    %20 = vector.extract_strided_slice %6 {offsets = [0, 64], sizes = [16, 8], strides = [1, 1]} : vector<16x96xf32> to vector<16x8xf32>
    %21 = vector.shape_cast %20 : vector<16x8xf32> to vector<2x8x8xf32>
    "tpu.trace_start"() <{level = 10 : i32, message = "bqd,bkd->bqk"}> : () -> ()
    %cst_11 = arith.constant dense<0.000000e+00> : vector<2x8x8xf32>
    %22 = tpu.matmul %17, %19, %cst_11 {dimension_numbers = #tpu.dot_dimension_numbers<[2], [2], [1], [1], [0, 0, 0, 1, 1, 1], [0], [0]>} : vector<2x8x8xf32>, vector<2x8x8xf32>, vector<2x8x8xf32> -> vector<2x8x8xf32>
    "tpu.trace_stop"() : () -> ()
    %23 = arith.addf %22, %15 : vector<2x8x8xf32>
    %cst_12 = arith.constant dense<0xFF800000> : vector<2x8xf32>
    %24 = vector.multi_reduction <maximumf>, %23, %cst_12 [2] : vector<2x8x8xf32> to vector<2x8xf32>
    %25 = vector.shape_cast %24 : vector<2x8xf32> to vector<2x8x1xf32>
    %26 = vector.broadcast %25 : vector<2x8x1xf32> to vector<2x8x8xf32>
    %27 = arith.subf %23, %26 : vector<2x8x8xf32>
    %28 = math.exp %27 : vector<2x8x8xf32>
    %cst_13 = arith.constant dense<0.000000e+00> : vector<2x8xf32>
    %29 = vector.multi_reduction <add>, %28, %cst_13 [2] : vector<2x8x8xf32> to vector<2x8xf32>
    %30 = vector.shape_cast %29 : vector<2x8xf32> to vector<2x8x1xf32>
    %31 = tpu.reciprocal %30 {approx = true} : vector<2x8x1xf32> -> vector<2x8x1xf32>
    %32 = vector.broadcast %31 : vector<2x8x1xf32> to vector<2x8x8xf32>
    %33 = arith.mulf %28, %32 : vector<2x8x8xf32>
    "tpu.trace_start"() <{level = 10 : i32, message = "bqk,bkd->bqd"}> : () -> ()
    %cst_14 = arith.constant dense<0.000000e+00> : vector<2x8x8xf32>
    %34 = tpu.matmul %33, %21, %cst_14 {dimension_numbers = #tpu.dot_dimension_numbers<[2], [1], [1], [2], [0, 0, 0, 1, 1, 2], [0], [0]>} : vector<2x8x8xf32>, vector<2x8x8xf32>, vector<2x8x8xf32> -> vector<2x8x8xf32>
    "tpu.trace_stop"() : () -> ()
    %c0_15 = arith.constant 0 : index
    %c0_16 = arith.constant 0 : index
    %c0_17 = arith.constant 0 : index
    %35 = vector.load %arg8[%c0_15, %c0_16, %c0_17] : memref<2x8x32xf32, #tpu.memory_space<vmem>>, vector<2x8x8xf32>
    tpu.vector_store %arg8[%c0_15, %c0_16, %c0_17], %34 {strides = array<i32>} : memref<2x8x32xf32, #tpu.memory_space<vmem>>, vector<2x8x8xf32>,
    %36 = vector.extract_strided_slice %6 {offsets = [0, 8], sizes = [16, 8], strides = [1, 1]} : vector<16x96xf32> to vector<16x8xf32>
    %37 = vector.shape_cast %36 : vector<16x8xf32> to vector<2x8x8xf32>
    %38 = vector.extract_strided_slice %6 {offsets = [0, 40], sizes = [16, 8], strides = [1, 1]} : vector<16x96xf32> to vector<16x8xf32>
    %39 = vector.shape_cast %38 : vector<16x8xf32> to vector<2x8x8xf32>
    %40 = vector.extract_strided_slice %6 {offsets = [0, 72], sizes = [16, 8], strides = [1, 1]} : vector<16x96xf32> to vector<16x8xf32>
    %41 = vector.shape_cast %40 : vector<16x8xf32> to vector<2x8x8xf32>
    "tpu.trace_start"() <{level = 10 : i32, message = "bqd,bkd->bqk"}> : () -> ()
    %cst_18 = arith.constant dense<0.000000e+00> : vector<2x8x8xf32>
    %42 = tpu.matmul %37, %39, %cst_18 {dimension_numbers = #tpu.dot_dimension_numbers<[2], [2], [1], [1], [0, 0, 0, 1, 1, 1], [0], [0]>} : vector<2x8x8xf32>, vector<2x8x8xf32>, vector<2x8x8xf32> -> vector<2x8x8xf32>
    "tpu.trace_stop"() : () -> ()
    %43 = arith.addf %42, %15 : vector<2x8x8xf32>
    %cst_19 = arith.constant dense<0xFF800000> : vector<2x8xf32>
    %44 = vector.multi_reduction <maximumf>, %43, %cst_19 [2] : vector<2x8x8xf32> to vector<2x8xf32>
    %45 = vector.shape_cast %44 : vector<2x8xf32> to vector<2x8x1xf32>
    %46 = vector.broadcast %45 : vector<2x8x1xf32> to vector<2x8x8xf32>
    %47 = arith.subf %43, %46 : vector<2x8x8xf32>
    %48 = math.exp %47 : vector<2x8x8xf32>
    %cst_20 = arith.constant dense<0.000000e+00> : vector<2x8xf32>
    %49 = vector.multi_reduction <add>, %48, %cst_20 [2] : vector<2x8x8xf32> to vector<2x8xf32>
    %50 = vector.shape_cast %49 : vector<2x8xf32> to vector<2x8x1xf32>
    %51 = tpu.reciprocal %50 {approx = true} : vector<2x8x1xf32> -> vector<2x8x1xf32>
    %52 = vector.broadcast %51 : vector<2x8x1xf32> to vector<2x8x8xf32>
    %53 = arith.mulf %48, %52 : vector<2x8x8xf32>
    "tpu.trace_start"() <{level = 10 : i32, message = "bqk,bkd->bqd"}> : () -> ()
    %cst_21 = arith.constant dense<0.000000e+00> : vector<2x8x8xf32>
    %54 = tpu.matmul %53, %41, %cst_21 {dimension_numbers = #tpu.dot_dimension_numbers<[2], [1], [1], [2], [0, 0, 0, 1, 1, 2], [0], [0]>} : vector<2x8x8xf32>, vector<2x8x8xf32>, vector<2x8x8xf32> -> vector<2x8x8xf32>
    "tpu.trace_stop"() : () -> ()
    %c0_22 = arith.constant 0 : index
    %c0_23 = arith.constant 0 : index
    %c8 = arith.constant 8 : index
    %55 = vector.load %arg8[%c0_22, %c0_23, %c8] : memref<2x8x32xf32, #tpu.memory_space<vmem>>, vector<2x8x8xf32>
    tpu.vector_store %arg8[%c0_22, %c0_23, %c8], %54 {strides = array<i32>} : memref<2x8x32xf32, #tpu.memory_space<vmem>>, vector<2x8x8xf32>,
    %56 = vector.extract_strided_slice %6 {offsets = [0, 16], sizes = [16, 8], strides = [1, 1]} : vector<16x96xf32> to vector<16x8xf32>
    %57 = vector.shape_cast %56 : vector<16x8xf32> to vector<2x8x8xf32>
    %58 = vector.extract_strided_slice %6 {offsets = [0, 48], sizes = [16, 8], strides = [1, 1]} : vector<16x96xf32> to vector<16x8xf32>
    %59 = vector.shape_cast %58 : vector<16x8xf32> to vector<2x8x8xf32>
    %60 = vector.extract_strided_slice %6 {offsets = [0, 80], sizes = [16, 8], strides = [1, 1]} : vector<16x96xf32> to vector<16x8xf32>
    %61 = vector.shape_cast %60 : vector<16x8xf32> to vector<2x8x8xf32>
    "tpu.trace_start"() <{level = 10 : i32, message = "bqd,bkd->bqk"}> : () -> ()
    %cst_24 = arith.constant dense<0.000000e+00> : vector<2x8x8xf32>
    %62 = tpu.matmul %57, %59, %cst_24 {dimension_numbers = #tpu.dot_dimension_numbers<[2], [2], [1], [1], [0, 0, 0, 1, 1, 1], [0], [0]>} : vector<2x8x8xf32>, vector<2x8x8xf32>, vector<2x8x8xf32> -> vector<2x8x8xf32>
    "tpu.trace_stop"() : () -> ()
    %63 = arith.addf %62, %15 : vector<2x8x8xf32>
    %cst_25 = arith.constant dense<0xFF800000> : vector<2x8xf32>
    %64 = vector.multi_reduction <maximumf>, %63, %cst_25 [2] : vector<2x8x8xf32> to vector<2x8xf32>
    %65 = vector.shape_cast %64 : vector<2x8xf32> to vector<2x8x1xf32>
    %66 = vector.broadcast %65 : vector<2x8x1xf32> to vector<2x8x8xf32>
    %67 = arith.subf %63, %66 : vector<2x8x8xf32>
    %68 = math.exp %67 : vector<2x8x8xf32>
    %cst_26 = arith.constant dense<0.000000e+00> : vector<2x8xf32>
    %69 = vector.multi_reduction <add>, %68, %cst_26 [2] : vector<2x8x8xf32> to vector<2x8xf32>
    %70 = vector.shape_cast %69 : vector<2x8xf32> to vector<2x8x1xf32>
    %71 = tpu.reciprocal %70 {approx = true} : vector<2x8x1xf32> -> vector<2x8x1xf32>
    %72 = vector.broadcast %71 : vector<2x8x1xf32> to vector<2x8x8xf32>
    %73 = arith.mulf %68, %72 : vector<2x8x8xf32>
    "tpu.trace_start"() <{level = 10 : i32, message = "bqk,bkd->bqd"}> : () -> ()
    %cst_27 = arith.constant dense<0.000000e+00> : vector<2x8x8xf32>
    %74 = tpu.matmul %73, %61, %cst_27 {dimension_numbers = #tpu.dot_dimension_numbers<[2], [1], [1], [2], [0, 0, 0, 1, 1, 2], [0], [0]>} : vector<2x8x8xf32>, vector<2x8x8xf32>, vector<2x8x8xf32> -> vector<2x8x8xf32>
    "tpu.trace_stop"() : () -> ()
    %c0_28 = arith.constant 0 : index
    %c0_29 = arith.constant 0 : index
    %c16 = arith.constant 16 : index
    %75 = vector.load %arg8[%c0_28, %c0_29, %c16] : memref<2x8x32xf32, #tpu.memory_space<vmem>>, vector<2x8x8xf32>
    tpu.vector_store %arg8[%c0_28, %c0_29, %c16], %74 {strides = array<i32>} : memref<2x8x32xf32, #tpu.memory_space<vmem>>, vector<2x8x8xf32>,
    %76 = vector.extract_strided_slice %6 {offsets = [0, 24], sizes = [16, 8], strides = [1, 1]} : vector<16x96xf32> to vector<16x8xf32>
    %77 = vector.shape_cast %76 : vector<16x8xf32> to vector<2x8x8xf32>
    %78 = vector.extract_strided_slice %6 {offsets = [0, 56], sizes = [16, 8], strides = [1, 1]} : vector<16x96xf32> to vector<16x8xf32>
    %79 = vector.shape_cast %78 : vector<16x8xf32> to vector<2x8x8xf32>
    %80 = vector.extract_strided_slice %6 {offsets = [0, 88], sizes = [16, 8], strides = [1, 1]} : vector<16x96xf32> to vector<16x8xf32>
    %81 = vector.shape_cast %80 : vector<16x8xf32> to vector<2x8x8xf32>
    "tpu.trace_start"() <{level = 10 : i32, message = "bqd,bkd->bqk"}> : () -> ()
    %cst_30 = arith.constant dense<0.000000e+00> : vector<2x8x8xf32>
    %82 = tpu.matmul %77, %79, %cst_30 {dimension_numbers = #tpu.dot_dimension_numbers<[2], [2], [1], [1], [0, 0, 0, 1, 1, 1], [0], [0]>} : vector<2x8x8xf32>, vector<2x8x8xf32>, vector<2x8x8xf32> -> vector<2x8x8xf32>
    "tpu.trace_stop"() : () -> ()
    %83 = arith.addf %82, %15 : vector<2x8x8xf32>
    %cst_31 = arith.constant dense<0xFF800000> : vector<2x8xf32>
    %84 = vector.multi_reduction <maximumf>, %83, %cst_31 [2] : vector<2x8x8xf32> to vector<2x8xf32>
    %85 = vector.shape_cast %84 : vector<2x8xf32> to vector<2x8x1xf32>
    %86 = vector.broadcast %85 : vector<2x8x1xf32> to vector<2x8x8xf32>
    %87 = arith.subf %83, %86 : vector<2x8x8xf32>
    %88 = math.exp %87 : vector<2x8x8xf32>
    %cst_32 = arith.constant dense<0.000000e+00> : vector<2x8xf32>
    %89 = vector.multi_reduction <add>, %88, %cst_32 [2] : vector<2x8x8xf32> to vector<2x8xf32>
    %90 = vector.shape_cast %89 : vector<2x8xf32> to vector<2x8x1xf32>
    %91 = tpu.reciprocal %90 {approx = true} : vector<2x8x1xf32> -> vector<2x8x1xf32>
    %92 = vector.broadcast %91 : vector<2x8x1xf32> to vector<2x8x8xf32>
    %93 = arith.mulf %88, %92 : vector<2x8x8xf32>
    "tpu.trace_start"() <{level = 10 : i32, message = "bqk,bkd->bqd"}> : () -> ()
    %cst_33 = arith.constant dense<0.000000e+00> : vector<2x8x8xf32>
    %94 = tpu.matmul %93, %81, %cst_33 {dimension_numbers = #tpu.dot_dimension_numbers<[2], [1], [1], [2], [0, 0, 0, 1, 1, 2], [0], [0]>} : vector<2x8x8xf32>, vector<2x8x8xf32>, vector<2x8x8xf32> -> vector<2x8x8xf32>
    "tpu.trace_stop"() : () -> ()
    %c0_34 = arith.constant 0 : index
    %c0_35 = arith.constant 0 : index
    %c24 = arith.constant 24 : index
    %95 = vector.load %arg8[%c0_34, %c0_35, %c24] : memref<2x8x32xf32, #tpu.memory_space<vmem>>, vector<2x8x8xf32>
    tpu.vector_store %arg8[%c0_34, %c0_35, %c24], %94 {strides = array<i32>} : memref<2x8x32xf32, #tpu.memory_space<vmem>>, vector<2x8x8xf32>,
    %c0_36 = arith.constant 0 : index
    %c0_37 = arith.constant 0 : index
    %c0_38 = arith.constant 0 : index
    %96 = vector.load %arg8[%c0_36, %c0_37, %c0_38] : memref<2x8x32xf32, #tpu.memory_space<vmem>>, vector<2x8x32xf32>
    %97 = vector.shape_cast %96 : vector<2x8x32xf32> to vector<16x32xf32>
    %c0_39 = arith.constant 0 : index
    %c0_40 = arith.constant 0 : index
    %98 = vector.load %arg5[%c0_39, %c0_40] : memref<32x32xf32, #tpu.memory_space<vmem>>, vector<32x32xf32>
    %cst_41 = arith.constant dense<0.000000e+00> : vector<16x32xf32>
    %99 = tpu.matmul %97, %98, %cst_41 {dimension_numbers = #tpu.dot_dimension_numbers<[1], [0], [0], [1], [0, 0, 1, 1], [], []>} : vector<16x32xf32>, vector<32x32xf32>, vector<16x32xf32> -> vector<16x32xf32>
    %c0_42 = arith.constant 0 : index
    %c0_43 = arith.constant 0 : index
    %100 = vector.load %arg6[%c0_42, %c0_43] : memref<1x32xf32, #tpu.memory_space<vmem>>, vector<1x32xf32>
    %101 = vector.broadcast %100 : vector<1x32xf32> to vector<16x32xf32>
    %102 = arith.addf %99, %101 : vector<16x32xf32>
    %103 = vector.shape_cast %102 : vector<16x32xf32> to vector<2x8x32xf32>
    %c0_44 = arith.constant 0 : index
    %c0_45 = arith.constant 0 : index
    %c0_46 = arith.constant 0 : index
    %104 = vector.load %arg7[%c0_44, %c0_45, %c0_46] : memref<2x8x32xf32, #tpu.memory_space<vmem>>, vector<2x8x32xf32>
    tpu.vector_store %arg7[%c0_44, %c0_45, %c0_46], %103 {strides = array<i32>} : memref<2x8x32xf32, #tpu.memory_space<vmem>>, vector<2x8x32xf32>,
    return
  }
  func.func @transform_0(%arg0: i32) -> (i32, i32, i32) {
    %c0_i32 = arith.constant 0 : i32
    %c0_i32_0 = arith.constant 0 : i32
    %c0_i32_1 = arith.constant 0 : i32
    return %arg0, %c0_i32, %c0_i32_0 : i32, i32, i32
  }
  func.func @transform_1(%arg0: i32) -> (i32, i32) {
    %c0_i32 = arith.constant 0 : i32
    %c0_i32_0 = arith.constant 0 : i32
    return %arg0, %c0_i32 : i32, i32
  }
  func.func @transform_2(%arg0: i32) -> (i32, i32) {
    %c0_i32 = arith.constant 0 : i32
    %c0_i32_0 = arith.constant 0 : i32
    %c0_i32_1 = arith.constant 0 : i32
    return %c0_i32, %c0_i32_0 : i32, i32
  }
  func.func @transform_3(%arg0: i32) -> (i32, i32) {
    %c0_i32 = arith.constant 0 : i32
    %c0_i32_0 = arith.constant 0 : i32
    %c0_i32_1 = arith.constant 0 : i32
    return %c0_i32, %c0_i32_0 : i32, i32
  }
  func.func @transform_4(%arg0: i32) -> (i32, i32) {
    %c0_i32 = arith.constant 0 : i32
    %c0_i32_0 = arith.constant 0 : i32
    %c0_i32_1 = arith.constant 0 : i32
    return %c0_i32, %c0_i32_0 : i32, i32
  }
  func.func @transform_5(%arg0: i32) -> (i32, i32) {
    %c0_i32 = arith.constant 0 : i32
    %c0_i32_0 = arith.constant 0 : i32
    %c0_i32_1 = arith.constant 0 : i32
    return %c0_i32, %c0_i32_0 : i32, i32
  }
  func.func @transform_6(%arg0: i32) -> (i32, i32, i32) {
    %c0_i32 = arith.constant 0 : i32
    %c0_i32_0 = arith.constant 0 : i32
    %c0_i32_1 = arith.constant 0 : i32
    return %arg0, %c0_i32, %c0_i32_0 : i32, i32, i32
  }
}

</mosaic_0001>

<bundles_post_ra>
// kernel: tpu_custom_call.1
= control target key start
LH: loop header
LB: loop body
LE: loop exit
PB: predicated region body
PF: predicated region fallthrough
CT: control target
= control target key end

     0   :  { %11 = vsyncpa [#allocation4], 0  ;;  %s2284_s0 = inlined_call_operand.hbm [shape: f32[2,8,32], index: 0, kind: input, shape index: {}]   ;;  %s2285_s1 = inlined_call_operand.vmem [shape: f32[2,8], index: 1, kind: input, shape index: {}]   ;;  %s2286_s2 = inlined_call_operand.hbm [shape: f32[32,96], index: 2, kind: input, shape index: {}]   ;;  %s2287_s3 = inlined_call_operand.vmem [shape: f32[1,96], index: 3, kind: input, shape index: {}]   ;;  %s2288_s4 = inlined_call_operand.hbm [shape: f32[32,32], index: 4, kind: input, shape index: {}]   ;;  %s2289_s5 = inlined_call_operand.vmem [shape: f32[1,32], index: 5, kind: input, shape index: {}]   ;;  %s2290_s6 = inlined_call_operand.hbm [shape: f32[2,8,32], index: 6, kind: output, shape index: {}]  }
   0x1   :  { %12 = vsyncpa [#allocation7], 0 }
   0x2   :  { %13 = vsyncpa [#allocation5], 0  ;;  %s2004_s21 = smov [#allocation6]   ;;  %s2005_s23 = smov [#allocation3]  }
   0x3   :  { %s33_s22 = sshll.u32 %s2004_s21, 4  ;;  %s19_s24 = sshll.u32 %s2005_s23, 4  ;;  %s34_s22 = int_to_ptr.vmem [resolvable:$true] %s33_s22  ;;  %s2061_s24 = int_to_ptr.vmem [resolvable:$true] %s19_s24 }
   0x4   :  { %s1910_s27 = scalar_lea.hbm %s2286_s2, 512 }
   0x5   :  { %p1911_p0 = scmp.ne.s32.totalorder %s2286_s2, %s1910_s27  ;;  %p1914_p1 = scmp.lt.u32.totalorder %s1910_s27, %s2286_s2 }
   0x7   :  { %p1916_p2 = pnand %p1914_p1, %p1911_p0 }
   0x9   :  { %1919 = shalt.err (!%p1916_p2)
}
   0xa   :  { %s1920_s8 = scalar_lea.vmem %s34_s22, 512  ;;  %p1925_p4 = scmp.lt.s32.totalorder %s34_s22, %s34_s22 }
   0xb   :  { %p1921_p3 = scmp.ne.s32.totalorder %s34_s22, %s1920_s8  ;;  %p1926_p5 = scmp.lt.s32.totalorder %s1920_s8, %s1920_s8 }
   0xd   :  { %p1927_p6 = por %p1926_p5, %p1925_p4 }
   0xf   :  { %p1928_p7 = pnand %p1927_p6, %p1921_p3 }
  0x11   :  { %1931 = shalt.err (!%p1928_p7)
}
  0x12   :  { %s2006_s9 = smov 128   ;;  %s2007_s10 = smov 8  }
  0x13   :  { %39 = dma.hbm_to_vmem [thread:$0]  %s2286_s2, 512, %s34_s22, [#allocation7], %s2006_s9, %s2006_s9, %s2007_s10  }
  0x14   :  { %s1932_s15 = scalar_lea.hbm %s2284_s0, 256 }
  0x15   :  { %p1933_p8 = scmp.ne.s32.totalorder %s2284_s0, %s1932_s15  ;;  %p1936_p9 = scmp.lt.u32.totalorder %s1932_s15, %s2284_s0 }
  0x17   :  { %p1938_p10 = pnand %p1936_p9, %p1933_p8 }
  0x19   :  { %1941 = shalt.err (!%p1938_p10)
}
  0x1a   :  { %s1942_s20 = scalar_lea.vmem %s2061_s24, 256  ;;  %p1947_p12 = scmp.lt.s32.totalorder %s2061_s24, %s2061_s24 }
  0x1b   :  { %p1943_p11 = scmp.ne.s32.totalorder %s2061_s24, %s1942_s20  ;;  %p1948_p13 = scmp.lt.s32.totalorder %s1942_s20, %s1942_s20 }
  0x1d   :  { %p1949_p0 = por %p1948_p13, %p1947_p12 }
  0x1f   :  { %p1950_p1 = pnand %p1949_p0, %p1943_p11 }
  0x21   :  { %1953 = shalt.err (!%p1950_p1)
}
  0x22   :  { %25 = dma.hbm_to_vmem [thread:$0]  %s2284_s0, 256, %s2061_s24, [#allocation4], %s2006_s9, %s2006_s9, %s2007_s10  }
  0x23   :  { %s2008_s22 = smov [#allocation8]   ;;  %s1954_s27 = scalar_lea.hbm %s2288_s4, 512 }
  0x24   :  { %s47_s23 = sshll.u32 %s2008_s22, 4  ;;  %p1955_p2 = scmp.ne.s32.totalorder %s2288_s4, %s1954_s27  ;;  %s48_s23 = int_to_ptr.vmem [resolvable:$true] %s47_s23 }
  0x25   :  { %p1958_p3 = scmp.lt.u32.totalorder %s1954_s27, %s2288_s4 }
  0x27   :  { %p1960_p4 = pnand %p1958_p3, %p1955_p2 }
  0x29   :  { %1963 = shalt.err (!%p1960_p4)
}
  0x2a   :  { %s1964_s8 = scalar_lea.vmem %s48_s23, 512  ;;  %p1969_p6 = scmp.lt.s32.totalorder %s48_s23, %s48_s23 }
  0x2b   :  { %p1965_p5 = scmp.ne.s32.totalorder %s48_s23, %s1964_s8  ;;  %p1970_p7 = scmp.lt.s32.totalorder %s1964_s8, %s1964_s8 }
  0x2d   :  { %p1971_p8 = por %p1970_p7, %p1969_p6 }
  0x2f   :  { %p1972_p9 = pnand %p1971_p8, %p1965_p5 }
  0x31   :  { %1975 = shalt.err (!%p1972_p9)
}
  0x32   :  { %53 = dma.hbm_to_vmem [thread:$0]  %s2288_s4, 512, %s48_s23, [#allocation7], %s2006_s9, %s2006_s9, %s2007_s10  }
  0x33   :  { %1998 = dma.done.wait [#allocation4], 256  }
  0x34   :  { %1999 = vsyncadd [#allocation4], 4294967040 }
  0x35   :  { %2000 = dma.done.wait [#allocation7], 1024  }
  0x36   :  { %2001 = vsyncadd [#allocation7], 4294966272  ;;  %vm78_vm0 = vcmask 261120   ;;  %v67_v0 = vld [vmem:[#allocation6] sm:$0xff]  ;;  %v68_v1 = vld [vmem:[#allocation6 + $0x8] sm:$0xff]  ;;  %v2009_v8 = vmov 0.0   ;;  %v167_v18 = vlaneseq }
  0x37   :  { %v69_v2 = vld [vmem:[#allocation6 + $0x10] sm:$0xff]  ;;  %v1840_v3 = vpack.c.bf16 %v68_v1, %v67_v0  ;;  %v70_v4 = vld [vmem:[#allocation6 + $0x18] sm:$0xff]  ;;  %1749 = vmatprep.subr.mxu1 %v2009_v8  ;;  %vm2010_vm1 = vmmov 0   ;;  %v1664_v9 = vld [vmem:[%s2287_s3] ss:$0 sm:$0xff]  ;;  %s2011_s12 = smov 96  }
  0x38   :  { %v65_v5 = vld [vmem:[#allocation3] sm:$0xff]  ;;  %v1844_v6 = vpack.c.bf16 %v70_v4, %v69_v2  ;;  %v66_v7 = vld [vmem:[#allocation3 + $0x8] sm:$0xff]  ;;  %1751 = vmatprep.mubr.msk.f32.mxu1 %vm2010_vm1, %v2009_v8  ;;  %vm199_vm2 = vcmask 64512   ;;  %v2012_v16 = vmov 1966171168   ;;  %v168_v21 = vshrl.u32 %v167_v18, 7 }
  0x39   :  { %1746 = vmatprep.mubr.msk.f32.mxu0 %vm78_vm0, %v65_v5  ;;  %1841 = vmatprep.subr.bf16.mxu0 %v1840_v3  ;;  %v165_v17 = vunpack.c.l.s4 %v2012_v16  ;;  %v160_v19 = vld [vmem:[%s2285_s1] sm:$0x3]  ;;  %s2013_s1 = smov 64   ;;  %s2014_s14 = smov 88   ;;  %vm865_vm4 = vcmask 130112   ;;  %vm1206_vm5 = vcmask 195712  }
  0x3a   :  { %1843 = vmatpush3.bf16.msra.mxu0 %v1840_v3  ;;  %vm161_vm3 = vcmp.eq.f32.partialorder %v160_v19, 0.0  ;;  %v188_v26 = vsub.s32 0, %v168_v21  ;;  %s2015_s15 = smov 120   ;;  %s2016_s16 = smov 56   ;;  %vm1547_vm6 = vcmask 261312  }
  0x3b   :  { %1845 = vmatprep.subr.bf16.mxu0 %v1844_v6  ;;  %v166_v20 = vunpack.c.0.s8 %v165_v17  ;;  %v162_v23 = vsel %vm161_vm3, -1e+20, %v2009_v8  ;;  %s2017_s17 = smov 112   ;;  %s2018_s18 = smov 80  }
  0x3c   :  { %s2019_s19 = smov 48   ;;  %s2020_s20 = smov 72  }
  0x3d   :  { %v169_v22 = vsub.s32 %v166_v20, %v168_v21  ;;  %s2021_s2 = smov 104   ;;  %s2022_s21 = smov 40  }
  0x3e   :  { %1847 = vmatpush3.bf16.msra.mxu0 %v1844_v6  ;;  %s2023_s22 = smov 16   ;;  %s2024_s23 = smov 24  }
  0x3f   :  { %1769 = vmatprep.subr.mxu0 %v2009_v8  ;;  %v170_v24 = vrot.slane %v162_v23, %v169_v22  ;;  %s2025_s27 = smov [#allocation9]  }
  0x40   :  { %s1651_s28 = sshll.u32 %s2025_s27, 4  ;;  %s1652_s28 = int_to_ptr.vmem [resolvable:$true] %s1651_s28 }
  0x41   :  { %1747 = vmatmul.mubr.msk.f32.vlgmr.msra.gmra.mrb[0].mxu0 %vm78_vm0, %v66_v7  ;;  %v178_v25 = vrot.slane %v170_v24, %v169_v22  ;;  %v171_v27 = vcombine.high %v170_v24, %v170_v24  ;;  %s1976_s29 = scalar_lea.vmem %s1652_s28, 256  ;;  %p1981_p11 = scmp.lt.s32.totalorder %s1652_s28, %s1652_s28 }
  0x42   :  { %1771 = vmatprep.mubr.msk.f32.mxu0 %vm2010_vm1, %v2009_v8  ;;  %p1977_p10 = scmp.ne.s32.totalorder %s1652_s28, %s1976_s29  ;;  %p1982_p12 = scmp.lt.s32.totalorder %s1976_s29, %s1976_s29 }
  0x43   :  { %v2146_v28 = vrot.slane %v178_v25, %v188_v26  ;;  %v185_v29 = vrot.slane %v171_v27, %v169_v22 }
  0x44   :  { %p1983_p13 = por %p1982_p12, %p1981_p11 }
  0x45   :  { %v2149_v33 = vrot.slane %v185_v29, %v188_v26 }
  0x46   :  { %p1984_p0 = pnand %p1983_p13, %p1977_p10 }
 0x114   :  { %v1748_v10 = vpop.f32.mrb[0].mxu0 }
 0x115   :  { %v151_v11 = vpop.f32.mrb[1].mxu0  ;;  %v2127_v13 = vadd.f32 %v1748_v10, %v1664_v9 }
 0x116   :  { %v2124_v12 = vadd.f32 %v1664_v9, %v151_v11 }
 0x118   :  { %197 = vrot.lane.b32.xlu0 %v2124_v12, %s2011_s12 }
 0x11c   :  { %275 = vrot.lane.b32.xlu0 %v2127_v13, %s2011_s12 }
 0x18a   :  { %v198_v14 = vpop.permute.xlu0 %197 }
 0x18b   :  { %1750 = vmatpush3.xpose.msk.msra.mxu1 %vm199_vm2, %v198_v14 }
 0x18c   :  { %1754 = vmatprep.subr.mxu1 %v2009_v8 }
 0x18e   :  { %1752 = vmatmul.mubr.msk.f32.vlgmr.msra.gmra.mrb[0].mxu1 %vm199_vm2, %v2124_v12  ;;  %v276_v15 = vpop.permute.xlu0 %275 }
 0x18f   :  { %1755 = vmatpush3.xpose.msk.msra.mxu1 %vm199_vm2, %v276_v15  ;;  %1756 = vmatprep.mubr.msk.f32.mxu1 %vm2010_vm1, %v2009_v8 }
 0x190   :  { %1759 = vmatprep.subr.mxu1 %v2009_v8 }
 0x192   :  { %1757 = vmatmul.mubr.msk.f32.vlgmr.msra.gmra.mrb[2].mxu1 %vm199_vm2, %v2127_v13 }
 0x193   :  { %1761 = vmatprep.mubr.msk.f32.mxu1 %vm2010_vm1, %v2009_v8 }
 0x261   :  { %v270_v30 = vpop.f32.mrb[0].mxu1 }
 0x262   :  { %v271_v31 = vadd.f32 %v270_v30, %v2146_v28  ;;  %v1753_v32 = vpop.f32.mrb[1].mxu1 }
 0x264   :  { %v351_v34 = vsel %vm199_vm2, %v271_v31, -inf }
 0x265   :  { %352 = vmax.xlane.f32.xlu1 %v351_v34  ;;  %v347_v35 = vpop.f32.mrb[2].mxu1 }
 0x266   :  { %v348_v36 = vadd.f32 %v347_v35, %v2149_v33  ;;  %v1758_v37 = vpop.f32.mrb[3].mxu1 }
 0x268   :  { %v354_v38 = vsel %vm199_vm2, %v348_v36, -inf }
 0x269   :  { %355 = vmax.xlane.f32.xlu1 %v354_v38 }
 0x27a   :  { %373 = vrot.lane.b32.xlu1 %v2124_v12, %s2013_s1 }
 0x27e   :  { %449 = vrot.lane.b32.xlu1 %v2127_v13, %s2013_s1 }
 0x282   :  { %529 = vrot.lane.b32.xlu1 %v2124_v12, %s2014_s14 }
 0x286   :  { %607 = vrot.lane.b32.xlu1 %v2127_v13, %s2014_s14 }
 0x2f2   :  { %v353_v39 = vpop.xlane.xlu1 %352 }
 0x2f3   :  { %v357_v40 = vsub.f32 %v271_v31, %v353_v39 }
 0x2f5   :  { %v359_v41 = vmul.f32 1.442695, %v357_v40 }
 0x2f6   :  { %v356_v42 = vpop.xlane.xlu1 %355 }
 0x2f7   :  { %1878 = vpow2.f32 %v359_v41  ;;  %v358_v43 = vsub.f32 %v348_v36, %v356_v42 }
 0x2f9   :  { %v361_v44 = vmul.f32 1.442695, %v358_v43 }
 0x2fa   :  { %v374_v45 = vpop.permute.xlu1 %373 }
 0x2fb   :  { %1880 = vpow2.f32 %v361_v44  ;;  %1760 = vmatpush3.msra.mxu1 %v374_v45 }
 0x2fc   :  { %1764 = vmatprep.subr.mxu1 %v2009_v8 }
 0x2fe   :  { %v450_v46 = vpop.permute.xlu1 %449 }
 0x301   :  { %v1879_v47 = vpop.eup %1878 }
 0x302   :  { %v530_v48 = vpop.permute.xlu1 %529  ;;  %v363_v49 = vsel %vm199_vm2, %v1879_v47, 0.0 }
 0x303   :  { %364 = vadd.xlane.f32.xlu0 %v363_v49  ;;  %1770 = vmatpush3.xpose.msk.msra.mxu0 %vm199_vm2, %v530_v48 }
 0x304   :  { %1779 = vmatprep.subr.mxu0 %v2009_v8 }
 0x305   :  { %v1881_v50 = vpop.eup %1880 }
 0x306   :  { %v366_v51 = vsel %vm199_vm2, %v1881_v50, 0.0  ;;  %v608_v52 = vpop.permute.xlu1 %607 }
 0x307   :  { %367 = vadd.xlane.f32.xlu1 %v366_v51 }
 0x318   :  { %605 = vrot.lane.b32.xlu1 %v2127_v13, %s2015_s15 }
 0x319   :  { %527 = vrot.lane.b32.xlu0 %v2124_v12, %s2015_s15 }
 0x390   :  { %v365_v53 = vpop.xlane.xlu0 %364 }
 0x391   :  { %1882 = vrcp.f32 %v365_v53 }
 0x394   :  { %v368_v54 = vpop.xlane.xlu1 %367  ;;  %v528_v55 = vpop.permute.xlu0 %527 }
 0x395   :  { %1884 = vrcp.f32 %v368_v54  ;;  %1772 = vmatmul.mubr.msk.f32.vlgmr.msra.gmra.mrb[2].mxu0 %vm199_vm2, %v528_v55 }
 0x396   :  { %1781 = vmatprep.mubr.msk.f32.mxu0 %vm2010_vm1, %v2009_v8 }
 0x398   :  { %v606_v60 = vpop.permute.xlu1 %605 }
 0x39b   :  { %v1883_v56 = vpop.eup %1882 }
 0x39c   :  { %v371_v57 = vmul.f32 %v1883_v56, %v1879_v47 }
 0x39e   :  { %1762 = vmatmul.mubr.msk.f32.vlgmr.msra.gmra.mrb[4].mxu1 %vm199_vm2, %v371_v57 }
 0x39f   :  { %v1885_v58 = vpop.eup %1884  ;;  %1765 = vmatpush3.msra.mxu1 %v450_v46  ;;  %1766 = vmatprep.mubr.msk.f32.mxu1 %vm2010_vm1, %v2009_v8 }
 0x3a0   :  { %v372_v59 = vmul.f32 %v1885_v58, %v1881_v50  ;;  %1774 = vmatprep.subr.mxu1 %v2009_v8 }
 0x3a2   :  { %1767 = vmatmul.mubr.msk.f32.vlgmr.msra.gmra.mrb[6].mxu1 %vm199_vm2, %v372_v59 }
 0x3a3   :  { %1776 = vmatprep.mubr.msk.f32.mxu1 %vm2010_vm1, %v2009_v8 }
 0x3a6   :  { %1775 = vmatpush3.xpose.msk.msra.mxu1 %vm199_vm2, %v608_v52 }
 0x3a7   :  { %1784 = vmatprep.subr.mxu1 %v2009_v8 }
 0x3a9   :  { %1777 = vmatmul.mubr.msk.f32.vlgmr.msra.gmra.mrb[8].mxu1 %vm199_vm2, %v606_v60 }
 0x3aa   :  { %1786 = vmatprep.mubr.msk.f32.mxu1 %vm2010_vm1, %v2009_v8 }
 0x468   :  { %v601_v61 = vpop.f32.mrb[2].mxu0 }
 0x469   :  { %v602_v62 = vadd.f32 %v601_v61, %v2146_v28  ;;  %v1773_v63 = vpop.f32.mrb[3].mxu0 }
 0x46b   :  { %v683_v0 = vsel %vm199_vm2, %v602_v62, -inf }
 0x46c   :  { %684 = vmax.xlane.f32.xlu1 %v683_v0 }
 0x471   :  { %v445_v1 = vpop.f32.mrb[4].mxu1 }
 0x472   :  { %525 = vst.msk [vmem:[#allocation2] sm:$0xff] %vm199_vm2, %v445_v1  ;;  %v1763_v2 = vpop.f32.mrb[5].mxu1 }
 0x475   :  { %v521_v3 = vpop.f32.mrb[6].mxu1 }
 0x476   :  { %526 = vst.msk [vmem:[#allocation2 + $0x8] sm:$0xff] %vm199_vm2, %v521_v3  ;;  %v1768_v4 = vpop.f32.mrb[7].mxu1 }
 0x47c   :  { %v679_v5 = vpop.f32.mrb[8].mxu1 }
 0x47d   :  { %v680_v6 = vadd.f32 %v679_v5, %v2149_v33  ;;  %v1778_v7 = vpop.f32.mrb[9].mxu1 }
 0x47f   :  { %v686_v9 = vsel %vm199_vm2, %v680_v6, -inf }
 0x480   :  { %687 = vmax.xlane.f32.xlu0 %v686_v9 }
 0x496   :  { %781 = vrot.lane.b32.xlu0 %v2127_v13, %s2016_s16 }
 0x49a   :  { %868 = vrot.lane.b32.xlu0 %v2124_v12, %s2017_s17 }
 0x4f9   :  { %v685_v10 = vpop.xlane.xlu1 %684 }
 0x4fa   :  { %v689_v11 = vsub.f32 %v602_v62, %v685_v10 }
 0x4fc   :  { %v691_v14 = vmul.f32 1.442695, %v689_v11 }
 0x4fe   :  { %1886 = vpow2.f32 %v691_v14 }
 0x508   :  { %v1887_v15 = vpop.eup %1886 }
 0x509   :  { %v695_v16 = vsel %vm199_vm2, %v1887_v15, 0.0 }
 0x50a   :  { %696 = vadd.xlane.f32.xlu1 %v695_v16 }
 0x50d   :  { %v688_v17 = vpop.xlane.xlu0 %687 }
 0x50e   :  { %v690_v19 = vsub.f32 %v680_v6, %v688_v17 }
 0x510   :  { %v693_v20 = vmul.f32 1.442695, %v690_v19 }
 0x511   :  { %v782_v18 = vpop.permute.xlu0 %781 }
 0x512   :  { %1785 = vmatpush3.msra.mxu1 %v782_v18  ;;  %1888 = vpow2.f32 %v693_v20 }
 0x513   :  { %1794 = vmatprep.subr.mxu1 %v2009_v8 }
 0x515   :  { %v869_v29 = vpop.permute.xlu0 %868 }
 0x51b   :  { %705 = vrot.lane.b32.xlu1 %v2124_v12, %s2016_s16 }
 0x51c   :  { %v1889_v21 = vpop.eup %1888 }
 0x51d   :  { %v698_v22 = vsel %vm199_vm2, %v1889_v21, 0.0 }
 0x51f   :  { %870 = vrot.lane.b32.xlu1 %v2124_v12, %s2018_s18 }
 0x523   :  { %948 = vrot.lane.b32.xlu1 %v2127_v13, %s2018_s18 }
 0x547   :  { %699 = vadd.xlane.f32.xlu1 %v698_v22 }
 0x558   :  { %946 = vrot.lane.b32.xlu1 %v2127_v13, %s2017_s17 }
 0x597   :  { %v697_v23 = vpop.xlane.xlu1 %696 }
 0x598   :  { %1890 = vrcp.f32 %v697_v23 }
 0x59b   :  { %v706_v24 = vpop.permute.xlu1 %705 }
 0x59c   :  { %1780 = vmatpush3.msra.mxu0 %v706_v24 }
 0x59d   :  { %1789 = vmatprep.subr.mxu0 %v2009_v8 }
 0x59f   :  { %v871_v27 = vpop.permute.xlu1 %870 }
 0x5a2   :  { %v1891_v25 = vpop.eup %1890 }
 0x5a3   :  { %v703_v26 = vmul.f32 %v1891_v25, %v1887_v15  ;;  %v949_v30 = vpop.permute.xlu1 %948 }
 0x5a5   :  { %1782 = vmatmul.mubr.msk.f32.vlgmr.msra.gmra.mrb[4].mxu0 %vm199_vm2, %v703_v26 }
 0x5a6   :  { %1790 = vmatpush3.xpose.msk.msra.mxu0 %vm199_vm2, %v871_v27  ;;  %1791 = vmatprep.mubr.msk.f32.mxu0 %vm2010_vm1, %v2009_v8 }
 0x5a7   :  { %1799 = vmatprep.subr.mxu0 %v2009_v8 }
 0x5a9   :  { %1792 = vmatmul.mubr.msk.f32.vlgmr.msra.gmra.mrb[6].mxu0 %vm199_vm2, %v869_v29 }
 0x5aa   :  { %1801 = vmatprep.mubr.msk.f32.mxu0 %vm2010_vm1, %v2009_v8 }
 0x5d4   :  { %v700_v31 = vpop.xlane.xlu1 %699 }
 0x5d5   :  { %1892 = vrcp.f32 %v700_v31 }
 0x5d8   :  { %v947_v35 = vpop.permute.xlu1 %946 }
 0x5df   :  { %v1893_v32 = vpop.eup %1892 }
 0x5e0   :  { %v704_v34 = vmul.f32 %v1893_v32, %v1889_v21 }
 0x5e2   :  { %1787 = vmatmul.mubr.msk.f32.vlgmr.msra.gmra.mrb[10].mxu1 %vm199_vm2, %v704_v34 }
 0x5e3   :  { %1795 = vmatpush3.xpose.msk.msra.mxu1 %vm199_vm2, %v949_v30  ;;  %1796 = vmatprep.mubr.msk.f32.mxu1 %vm2010_vm1, %v2009_v8 }
 0x5e4   :  { %1804 = vmatprep.subr.mxu1 %v2009_v8 }
 0x5e6   :  { %1797 = vmatmul.mubr.msk.f32.vlgmr.msra.gmra.mrb[12].mxu1 %vm199_vm2, %v947_v35 }
 0x5e7   :  { %1806 = vmatprep.mubr.msk.f32.mxu1 %vm2010_vm1, %v2009_v8 }
 0x678   :  { %v2212_v36 = vpop.f32.mrb[4].mxu0 }
 0x679   :  { %v1783_v37 = vpop.f32.mrb[5].mxu0 }
 0x67c   :  { %v942_v38 = vpop.f32.mrb[6].mxu0 }
 0x67d   :  { %v943_v39 = vadd.f32 %v942_v38, %v2146_v28  ;;  %v1793_v40 = vpop.f32.mrb[7].mxu0 }
 0x67f   :  { %v1024_v41 = vsel %vm199_vm2, %v943_v39, -inf }
 0x680   :  { %1025 = vmax.xlane.f32.xlu0 %v1024_v41  ;;  %v1552_v41 = vld [vmem:[#allocation8] sm:$0xff] }
 0x6b5   :  { %v2216_v42 = vpop.f32.mrb[10].mxu1 }
 0x6b6   :  { %v1788_v43 = vpop.f32.mrb[11].mxu1 }
 0x6b9   :  { %v1020_v44 = vpop.f32.mrb[12].mxu1 }
 0x6ba   :  { %v1021_v45 = vadd.f32 %v1020_v44, %v2149_v33  ;;  %v1798_v46 = vpop.f32.mrb[13].mxu1 }
 0x6bb   :  { %v1555_v46 = vld [vmem:[#allocation8 + $0x18] sm:$0xff] }
 0x6bc   :  { %v1027_v47 = vsel %vm199_vm2, %v1021_v45, -inf }
 0x6bd   :  { %1028 = vmax.xlane.f32.xlu1 %v1027_v47 }
 0x6ce   :  { %1046 = vrot.lane.b32.xlu1 %v2124_v12, %s2019_s19 }
 0x6d2   :  { %1211 = vrot.lane.b32.xlu1 %v2124_v12, %s2020_s20 }
 0x6d6   :  { %1289 = vrot.lane.b32.xlu1 %v2127_v13, %s2020_s20 }
 0x6da   :  { %1287 = vrot.lane.b32.xlu1 %v2127_v13, %s2021_s2 }
 0x70d   :  { %v1026_v48 = vpop.xlane.xlu0 %1025 }
 0x70e   :  { %v1030_v49 = vsub.f32 %v943_v39, %v1026_v48 }
 0x710   :  { %v1032_v50 = vmul.f32 1.442695, %v1030_v49 }
 0x712   :  { %1894 = vpow2.f32 %v1032_v50 }
 0x71c   :  { %v1895_v51 = vpop.eup %1894 }
 0x71d   :  { %v1036_v52 = vsel %vm199_vm2, %v1895_v51, 0.0 }
 0x71e   :  { %1037 = vadd.xlane.f32.xlu0 %v1036_v52 }
 0x734   :  { %1122 = vrot.lane.b32.xlu0 %v2127_v13, %s2019_s19 }
 0x74a   :  { %v1029_v53 = vpop.xlane.xlu1 %1028 }
 0x74b   :  { %v1031_v54 = vsub.f32 %v1021_v45, %v1029_v53  ;;  %v1554_v45 = vld [vmem:[#allocation8 + $0x10] sm:$0xff] }
 0x74c   :  { %v1852_v47 = vpack.c.bf16 %v1555_v46, %v1554_v45 }
 0x74d   :  { %v1034_v55 = vmul.f32 1.442695, %v1031_v54  ;;  %v1691_v54 = vld [vmem:[%s2289_s5] ss:$0 sm:$0xff] }
 0x74e   :  { %v1047_v56 = vpop.permute.xlu1 %1046 }
 0x74f   :  { %1896 = vpow2.f32 %v1034_v55  ;;  %1800 = vmatpush3.msra.mxu0 %v1047_v56 }
 0x750   :  { %1809 = vmatprep.subr.mxu0 %v2009_v8 }
 0x752   :  { %v1212_v63 = vpop.permute.xlu1 %1211 }
 0x756   :  { %v1290_v3 = vpop.permute.xlu1 %1289 }
 0x759   :  { %v1897_v57 = vpop.eup %1896 }
 0x75a   :  { %v1039_v58 = vsel %vm199_vm2, %v1897_v57, 0.0  ;;  %v1288_v5 = vpop.permute.xlu1 %1287 }
 0x75b   :  { %1040 = vadd.xlane.f32.xlu0 %v1039_v58 }
 0x771   :  { %1209 = vrot.lane.b32.xlu0 %v2124_v12, %s2021_s2 }
 0x7ab   :  { %v1038_v59 = vpop.xlane.xlu0 %1037 }
 0x7ac   :  { %1898 = vrcp.f32 %v1038_v59 }
 0x7af   :  { %v1123_v60 = vpop.permute.xlu0 %1122 }
 0x7b0   :  { %1805 = vmatpush3.msra.mxu1 %v1123_v60 }
 0x7b1   :  { %1814 = vmatprep.subr.mxu1 %v2009_v8 }
 0x7b6   :  { %v1899_v61 = vpop.eup %1898 }
 0x7b7   :  { %v1044_v62 = vmul.f32 %v1899_v61, %v1895_v51 }
 0x7b9   :  { %1802 = vmatmul.mubr.msk.f32.vlgmr.msra.gmra.mrb[8].mxu0 %vm199_vm2, %v1044_v62 }
 0x7ba   :  { %1810 = vmatpush3.xpose.msk.msra.mxu0 %vm199_vm2, %v1212_v63  ;;  %1811 = vmatprep.mubr.msk.f32.mxu0 %vm2010_vm1, %v2009_v8 }
 0x7bb   :  { %1819 = vmatprep.subr.mxu0 %v2009_v8 }
 0x7e8   :  { %v1041_v0 = vpop.xlane.xlu0 %1040 }
 0x7e9   :  { %1900 = vrcp.f32 %v1041_v0 }
 0x7ec   :  { %v1210_v1 = vpop.permute.xlu0 %1209 }
 0x7ed   :  { %1812 = vmatmul.mubr.msk.f32.vlgmr.msra.gmra.mrb[10].mxu0 %vm199_vm2, %v1210_v1 }
 0x7ee   :  { %1821 = vmatprep.mubr.msk.f32.mxu0 %vm2010_vm1, %v2009_v8 }
 0x7f3   :  { %v1901_v2 = vpop.eup %1900 }
 0x7f4   :  { %v1045_v4 = vmul.f32 %v1901_v2, %v1897_v57 }
 0x7f6   :  { %1807 = vmatmul.mubr.msk.f32.vlgmr.msra.gmra.mrb[14].mxu1 %vm199_vm2, %v1045_v4 }
 0x7f7   :  { %1815 = vmatpush3.xpose.msk.msra.mxu1 %vm199_vm2, %v1290_v3  ;;  %1816 = vmatprep.mubr.msk.f32.mxu1 %vm2010_vm1, %v2009_v8 }
 0x7f8   :  { %1824 = vmatprep.subr.mxu1 %v2009_v8 }
 0x7fa   :  { %1817 = vmatmul.mubr.msk.f32.vlgmr.msra.gmra.mrb[16].mxu1 %vm199_vm2, %v1288_v5 }
 0x7fb   :  { %1826 = vmatprep.mubr.msk.f32.mxu1 %vm2010_vm1, %v2009_v8 }
 0x88c   :  { %v1118_v6 = vpop.f32.mrb[8].mxu0 }
 0x88d   :  { %v1803_v7 = vpop.f32.mrb[9].mxu0 }
 0x8c0   :  { %v1283_v9 = vpop.f32.mrb[10].mxu0 }
 0x8c1   :  { %v1284_v10 = vadd.f32 %v1283_v9, %v2146_v28  ;;  %v1813_v11 = vpop.f32.mrb[11].mxu0 }
 0x8c3   :  { %v1365_v14 = vsel %vm199_vm2, %v1284_v10, -inf }
 0x8c4   :  { %1366 = vmax.xlane.f32.xlu0 %v1365_v14 }
 0x8c9   :  { %v1194_v15 = vpop.f32.mrb[14].mxu1 }
 0x8ca   :  { %v1808_v16 = vpop.f32.mrb[15].mxu1 }
 0x8cd   :  { %v1361_v17 = vpop.f32.mrb[16].mxu1 }
 0x8ce   :  { %v1362_v18 = vadd.f32 %v1361_v17, %v2149_v33  ;;  %v1818_v19 = vpop.f32.mrb[17].mxu1 }
 0x8d0   :  { %v1368_v20 = vsel %vm199_vm2, %v1362_v18, -inf }
 0x8d1   :  { %1369 = vmax.xlane.f32.xlu1 %v1368_v20 }
 0x8e2   :  { %1387 = vrot.lane.b32.xlu1 %v2124_v12, %s2022_s21 }
 0x8e6   :  { %859 = vrot.lane.b32.xlu1 %v2212_v36, %s2007_s10 }
 0x8ea   :  { %861 = vrot.lane.b32.xlu1 %v2216_v42, %s2007_s10 }
 0x8ee   :  { %1202 = vrot.lane.b32.xlu1 %v1194_v15, %s2023_s22 }
 0x951   :  { %v1367_v8 = vpop.xlane.xlu0 %1366 }
 0x952   :  { %v1371_v28 = vsub.f32 %v1284_v10, %v1367_v8 }
 0x954   :  { %v1373_v21 = vmul.f32 1.442695, %v1371_v28 }
 0x956   :  { %1902 = vpow2.f32 %v1373_v21 }
 0x95e   :  { %v1370_v33 = vpop.xlane.xlu1 %1369 }
 0x95f   :  { %v1372_v22 = vsub.f32 %v1362_v18, %v1370_v33 }
 0x960   :  { %v1903_v23 = vpop.eup %1902 }
 0x961   :  { %v1375_v24 = vmul.f32 1.442695, %v1372_v22  ;;  %v1377_v25 = vsel %vm199_vm2, %v1903_v23, 0.0 }
 0x962   :  { %v1388_v26 = vpop.permute.xlu1 %1387  ;;  %1378 = vadd.xlane.f32.xlu0 %v1377_v25 }
 0x963   :  { %1904 = vpow2.f32 %v1375_v24  ;;  %1820 = vmatpush3.msra.mxu0 %v1388_v26 }
 0x966   :  { %v860_v12 = vpop.permute.xlu1 %859 }
 0x967   :  { %866 = vst.msk [vmem:[#allocation2] sm:$0xff] %vm865_vm4, %v860_v12 }
 0x96a   :  { %v862_v27 = vpop.permute.xlu1 %861 }
 0x96b   :  { %867 = vst.msk [vmem:[#allocation2 + $0x8] sm:$0xff] %vm865_vm4, %v862_v27 }
 0x96d   :  { %v1905_v29 = vpop.eup %1904 }
 0x96e   :  { %v1203_v30 = vpop.permute.xlu1 %1202  ;;  %v1380_v31 = vsel %vm199_vm2, %v1905_v29, 0.0 }
 0x96f   :  { %1208 = vst.msk [vmem:[#allocation2 + $0x8] sm:$0xff] %vm1206_vm5, %v1203_v30  ;;  %1381 = vadd.xlane.f32.xlu0 %v1380_v31 }
 0x985   :  { %1463 = vrot.lane.b32.xlu0 %v2127_v13, %s2022_s21  ;;  %v1553_v13 = vld [vmem:[#allocation8 + $0x8] sm:$0xff] }
 0x986   :  { %v1848_v43 = vpack.c.bf16 %v1553_v13, %v1552_v41 }
 0x988   :  { %1849 = vmatprep.subr.bf16.mxu0 %v1848_v43 }
 0x989   :  { %1200 = vrot.lane.b32.xlu0 %v1118_v6, %s2023_s22 }
 0x9ef   :  { %v1379_v32 = vpop.xlane.xlu0 %1378 }
 0x9f0   :  { %1906 = vrcp.f32 %v1379_v32 }
 0x9fa   :  { %v1907_v34 = vpop.eup %1906 }
 0x9fb   :  { %v1385_v35 = vmul.f32 %v1907_v34, %v1903_v23 }
 0x9fc   :  { %v1382_v36 = vpop.xlane.xlu0 %1381 }
 0x9fd   :  { %1908 = vrcp.f32 %v1382_v36  ;;  %1822 = vmatmul.mubr.msk.f32.vlgmr.msra.gmra.mrb[12].mxu0 %vm199_vm2, %v1385_v35 }
 0x9fe   :  { %1851 = vmatpush3.bf16.msra.mxu0 %v1848_v43 }
 0x9ff   :  { %1853 = vmatprep.subr.bf16.mxu0 %v1852_v47 }
 0xa00   :  { %v1464_v37 = vpop.permute.xlu0 %1463 }
 0xa01   :  { %1825 = vmatpush3.msra.mxu1 %v1464_v37 }
 0xa02   :  { %1855 = vmatpush3.bf16.msra.mxu0 %v1852_v47 }
 0xa04   :  { %v1201_v38 = vpop.permute.xlu0 %1200 }
 0xa05   :  { %1207 = vst.msk [vmem:[#allocation2] sm:$0xff] %vm1206_vm5, %v1201_v38 }
 0xa07   :  { %v1909_v39 = vpop.eup %1908 }
 0xa08   :  { %v1386_v40 = vmul.f32 %v1909_v39, %v1905_v29 }
 0xa0a   :  { %1827 = vmatmul.mubr.msk.f32.vlgmr.msra.gmra.mrb[18].mxu1 %vm199_vm2, %v1386_v40 }
 0xad0   :  { %v1459_v42 = vpop.f32.mrb[12].mxu0 }
 0xad1   :  { %1541 = vrot.lane.b32.xlu0 %v1459_v42, %s2024_s23  ;;  %v1823_v44 = vpop.f32.mrb[13].mxu0 }
 0xadd   :  { %v1535_v48 = vpop.f32.mrb[18].mxu1 }
 0xade   :  { %1543 = vrot.lane.b32.xlu1 %v1535_v48, %s2024_s23  ;;  %v1828_v49 = vpop.f32.mrb[19].mxu1 }
 0xb43   :  { %v1542_v50 = vpop.permute.xlu0 %1541 }
 0xb44   :  { %1548 = vst.msk [vmem:[#allocation2] sm:$0xff] %vm1547_vm6, %v1542_v50 }
 0xb4b   :  { %v1550_v51 = vld [vmem:[#allocation2] sm:$0xff] }
 0xb4c   :  { %1837 = vmatprep.mubr.msk.f32.mxu0 %vm78_vm0, %v1550_v51 }
 0xb50   :  { %v1544_v52 = vpop.permute.xlu1 %1543 }
 0xb51   :  { %1549 = vst.msk [vmem:[#allocation2 + $0x8] sm:$0xff] %vm1547_vm6, %v1544_v52 }
 0xb58   :  { %v1551_v53 = vld [vmem:[#allocation2 + $0x8] sm:$0xff] }
 0xb59   :  { %1838 = vmatmul.mubr.msk.f32.vlgmr.msra.gmra.mrb[14].mxu0 %vm78_vm0, %v1551_v53 }
 0xc2c   :  { %v1839_v55 = vpop.f32.mrb[14].mxu0 }
 0xc2d   :  { %v1641_v56 = vadd.f32 %v1839_v55, %v1691_v54  ;;  %v1635_v57 = vpop.f32.mrb[15].mxu0 }
 0xc2e   :  { %v1636_v58 = vadd.f32 %v1691_v54, %v1635_v57 }
 0xc2f   :  { %1645 = vst.msk [vmem:[#allocation9 + $0x8] sm:$0xff] %vm78_vm0, %v1641_v56 }
 0xc30   :  { %1644 = vst.msk [vmem:[#allocation9] sm:$0xff] %vm78_vm0, %v1636_v58 }
 0xc31   :  { %1987 = shalt.err (!%p1984_p0)
}
 0xc32   :  { %s1988_s7 = scalar_lea.hbm %s2290_s6, 256 }
 0xc33   :  { %p1989_p1 = scmp.ne.s32.totalorder %s2290_s6, %s1988_s7  ;;  %p1992_p2 = scmp.lt.u32.totalorder %s1988_s7, %s2290_s6 }
 0xc35   :  { %p1994_p3 = pnand %p1992_p2, %p1989_p1 }
 0xc37   :  { %1997 = shalt.err (!%p1994_p3)
}
 0xc38   :  { %1657 = dma.vmem_to_hbm [thread:$0]  %s1652_s28, 256, %s2290_s6, [#allocation5], %s2006_s9, %s2006_s9, %s2007_s10  }
 0xc39   :  { %2002 = dma.done.wait [#allocation5], 256  }
 0xc3a   :  { %2003 = vsyncadd [#allocation5], 4294967040 }
 0xc3b   :  { %1661 = vsyncpa [#allocation4], 1 }
 0xc3c   :  { %1662 = vsyncpa [#allocation7], 1 }
 0xc3d   :  { %1663 = vsyncpa [#allocation5], 1 }

</bundles_post_ra>
